<compile_context>
chip_gen: v6e
topology: v6e:2x2x1
jax: 0.10.0
libtpu: 0.0.40
codegen_flags: <defaults>
</compile_context>

<pallas_src>
import math
from functools import partial

import jax
import jax.numpy as jnp
from jax.experimental import pallas as pl
from jax.experimental.pallas import tpu as pltpu

_LANE = 128


def _pointwise_classifier_kernel(x_ref, w_ref, b_ref, o_ref):
    """One S-tile of the per-location classifiers.

    Block shapes (TS = tile along flattened spatial axis, on the 128-lane axis):
      x_ref: (B, D, TS)   w_ref: (C, D, TS)   b_ref: (C, TS)   o_ref: (B, C, TS)

    out[b, c, s] = sum_d x[b, d, s] * w[c, d, s] + bias[c, s]
    Pure VPU broadcast-multiply + sublane reduction over D; stores are
    lane-dense (TS is a multiple of 128 or the full S).
    """
    w = w_ref[...].astype(jnp.float32)       # (C, D, TS)
    bias = b_ref[...].astype(jnp.float32)    # (C, TS)
    for b in range(x_ref.shape[0]):          # small static batch, unrolled
        xb = x_ref[b].astype(jnp.float32)    # (D, TS)
        # f32 accumulate: multiply then reduce over D (sublane axis).
        acc = jnp.sum(w * xb[None, :, :], axis=1)        # (C, TS)
        o_ref[b] = (acc + bias).astype(o_ref.dtype)


def pointwise_classifiers(x, weights, bias, spatial_shape, *, max_tile=1024):
    """Forward pass of PointwiseClassifiers.

    Args:
      x:       [B, D, *spatial_shape]  float32
      weights: [C, S, D]               float32  (S = prod(spatial_shape))
      bias:    [C, S]                  float32
    Returns:
      out:     [B, C, *spatial_shape]
    """
    B, D = x.shape[0], x.shape[1]
    C, S, D_w = weights.shape
    assert D == D_w
    assert S == math.prod(spatial_shape)

    # --- Choose the S tile (lane axis): largest multiple of 128 that fits a
    # conservative double-buffered VMEM budget (safe on v5e/v6e and on v7x's
    # smaller 64 MiB VMEM), capped by `max_tile` and by padded S.
    bytes_per_loc = 4 * (B * D + C * D + C + B * C)       # f32 stream per location
    vmem_budget = 8 * 1024 * 1024                         # for double-buffered blocks
    fit = max(_LANE, (vmem_budget // (2 * bytes_per_loc)) // _LANE * _LANE)
    ts = min(max_tile, fit, pl.cdiv(S, _LANE) * _LANE)
    s_pad = pl.cdiv(S, ts) * ts
    num_tiles = s_pad // ts

    # --- Layout: keep S last everywhere (no transposes of x or the output).
    x_s = x.reshape(B, D, S)                  # free: S is already the trailing axis
    w_s = jnp.transpose(weights, (0, 2, 1))   # [C, D, S]; weights are static (one-time)
    b_s = bias                                # [C, S]

    if s_pad != S:                            # pad S to a full lane-dense tile
        pad = s_pad - S
        x_s = jnp.pad(x_s, ((0, 0), (0, 0), (0, pad)))
        w_s = jnp.pad(w_s, ((0, 0), (0, 0), (0, pad)))
        b_s = jnp.pad(b_s, ((0, 0), (0, pad)))

    out = pl.pallas_call(
        _pointwise_classifier_kernel,
        out_shape=jax.ShapeDtypeStruct((B, C, s_pad), x.dtype),
        grid_spec=pltpu.PrefetchScalarGridSpec(
            num_scalar_prefetch=0,
            grid=(num_tiles,),
            in_specs=[
                pl.BlockSpec((B, D, ts), lambda s: (0, 0, s)),
                pl.BlockSpec((C, D, ts), lambda s: (0, 0, s)),
                pl.BlockSpec((C, ts), lambda s: (0, s)),
            ],
            out_specs=pl.BlockSpec((B, C, ts), lambda s: (0, 0, s)),
        ),
        compiler_params=pltpu.CompilerParams(
            # Independent S tiles: lets v7x shard them across its 2 TensorCores.
            dimension_semantics=("parallel",),
        ),
    )(x_s, w_s, b_s)                          # [B, C, s_pad]

    if s_pad != S:
        out = out[:, :, :S]
    return out.reshape(B, C, *spatial_shape)


def init_params(key, spatial_shape, feat_size, num_class):
    """Deterministic parameter init mirroring the module's __init__.

    weights: [num_class, S, feat_size], each weights[:, i, :] has orthonormal
             rows (like nn.init.orthogonal_ for num_class <= feat_size).
    bias:    [num_class, S] zeros.
    """
    S = math.prod(spatial_shape)
    a = jax.random.normal(key, (S, feat_size, num_class), dtype=jnp.float32)

    def _orth(m):                       # m: [feat_size, num_class]
        q, r = jnp.linalg.qr(m)         # q: orthonormal columns
        q = q * jnp.sign(jnp.diagonal(r))[None, :]
        return q.T                      # [num_class, feat_size]

    w_per_s = jax.vmap(_orth)(a)                      # [S, C, D]
    weights = jnp.transpose(w_per_s, (1, 0, 2))       # [C, S, D]
    bias = jnp.zeros((num_class, S), dtype=jnp.float32)
    return weights, bias


def _reference(x, weights, bias, spatial_shape):
    B, D = x.shape[0], x.shape[1]
    C, S, _ = weights.shape
    x_flat = x.reshape(B, D, S)
    ref = jnp.einsum("bds,csd->bcs", x_flat, weights) + bias[None]
    return ref.reshape(B, C, *spatial_shape)


if __name__ == "__main__":
    B = 2
    feat_size = 32
    num_class = 6

    key = jax.random.PRNGKey(0)

    cases = [
        ((16, 16), 1024),   # S=256: one lane-dense tile
        ((16, 16), 128),    # S=256, TS=128: multi-tile grid (pipelined/parallel)
        ((5, 5), 1024),     # S=25: padded up to 128 lanes
    ]
    for spatial_shape, max_tile in cases:
        k_x, k_w, k_b, key = jax.random.split(key, 4)
        x = jax.random.normal(k_x, (B, feat_size, *spatial_shape), dtype=jnp.float32)
        weights, bias = init_params(k_w, spatial_shape, feat_size, num_class)
        # Use a nonzero bias so the bias add is actually exercised.
        bias = 0.1 * jax.random.normal(k_b, bias.shape, dtype=jnp.float32)

        fn = jax.jit(partial(pointwise_classifiers,
                             spatial_shape=spatial_shape, max_tile=max_tile))
        out = jax.block_until_ready(fn(x, weights, bias))

        ref = _reference(x, weights, bias, spatial_shape)
        assert out.shape == (B, num_class, *spatial_shape)
        assert jnp.allclose(out, ref, atol=1e-5, rtol=1e-5), (spatial_shape, max_tile)

    print("KERNEL_OK")
</pallas_src>

<mosaic_0001>
module attributes {stable_mosaic.version = 11 : i64} {
  func.func @_pointwise_classifier_kernel(%arg0: i32, %arg1: memref<2x32x256xf32, #tpu.memory_space<vmem>>, %arg2: memref<6x32x256xf32, #tpu.memory_space<vmem>>, %arg3: memref<6x256xf32, #tpu.memory_space<vmem>>, %arg4: memref<2x6x256xf32, #tpu.memory_space<vmem>>) attributes {dimension_semantics = [#tpu.dimension_semantics<parallel>], iteration_bounds = array<i64: 1>, scalar_prefetch = 0 : i64, scratch_operands = 0 : i64, tpu.core_type = #tpu.core_type<tc>, window_params = [{transform_indices = @transform_0, window_bounds = array<i64: 2, 32, 256>}, {transform_indices = @transform_1, window_bounds = array<i64: 6, 32, 256>}, {transform_indices = @transform_2, window_bounds = array<i64: 6, 256>}, {transform_indices = @transform_3, window_bounds = array<i64: 2, 6, 256>}]} {
    %c0 = arith.constant 0 : index
    %c0_0 = arith.constant 0 : index
    %c0_1 = arith.constant 0 : index
    %0 = vector.load %arg2[%c0, %c0_0, %c0_1] : memref<6x32x256xf32, #tpu.memory_space<vmem>>, vector<6x32x256xf32>
    %c0_2 = arith.constant 0 : index
    %c0_3 = arith.constant 0 : index
    %1 = vector.load %arg3[%c0_2, %c0_3] : memref<6x256xf32, #tpu.memory_space<vmem>>, vector<6x256xf32>
    %c0_4 = arith.constant 0 : index
    %c0_5 = arith.constant 0 : index
    %c0_6 = arith.constant 0 : index
    %2 = vector.load %arg1[%c0_4, %c0_5, %c0_6] : memref<2x32x256xf32, #tpu.memory_space<vmem>>, vector<1x32x256xf32>
    %3 = vector.shape_cast %2 : vector<1x32x256xf32> to vector<32x256xf32>
    %4 = vector.shape_cast %3 : vector<32x256xf32> to vector<1x32x256xf32>
    %5 = vector.broadcast %4 : vector<1x32x256xf32> to vector<6x32x256xf32>
    %6 = arith.mulf %0, %5 : vector<6x32x256xf32>
    %cst = arith.constant dense<0.000000e+00> : vector<6x256xf32>
    %7 = vector.multi_reduction <add>, %6, %cst [1] : vector<6x32x256xf32> to vector<6x256xf32>
    %8 = arith.addf %7, %1 : vector<6x256xf32>
    %c0_7 = arith.constant 0 : index
    %c0_8 = arith.constant 0 : index
    %c0_9 = arith.constant 0 : index
    %9 = vector.load %arg4[%c0_7, %c0_8, %c0_9] : memref<2x6x256xf32, #tpu.memory_space<vmem>>, vector<1x6x256xf32>
    %10 = vector.shape_cast %9 : vector<1x6x256xf32> to vector<6x256xf32>
    %11 = vector.shape_cast %8 : vector<6x256xf32> to vector<1x6x256xf32>
    tpu.vector_store %arg4[%c0_7, %c0_8, %c0_9], %11 {strides = array<i32>} : memref<2x6x256xf32, #tpu.memory_space<vmem>>, vector<1x6x256xf32>,
    %c1 = arith.constant 1 : index
    %c0_10 = arith.constant 0 : index
    %c0_11 = arith.constant 0 : index
    %12 = vector.load %arg1[%c1, %c0_10, %c0_11] : memref<2x32x256xf32, #tpu.memory_space<vmem>>, vector<1x32x256xf32>
    %13 = vector.shape_cast %12 : vector<1x32x256xf32> to vector<32x256xf32>
    %14 = vector.shape_cast %13 : vector<32x256xf32> to vector<1x32x256xf32>
    %15 = vector.broadcast %14 : vector<1x32x256xf32> to vector<6x32x256xf32>
    %16 = arith.mulf %0, %15 : vector<6x32x256xf32>
    %cst_12 = arith.constant dense<0.000000e+00> : vector<6x256xf32>
    %17 = vector.multi_reduction <add>, %16, %cst_12 [1] : vector<6x32x256xf32> to vector<6x256xf32>
    %18 = arith.addf %17, %1 : vector<6x256xf32>
    %c1_13 = arith.constant 1 : index
    %c0_14 = arith.constant 0 : index
    %c0_15 = arith.constant 0 : index
    %19 = vector.load %arg4[%c1_13, %c0_14, %c0_15] : memref<2x6x256xf32, #tpu.memory_space<vmem>>, vector<1x6x256xf32>
    %20 = vector.shape_cast %19 : vector<1x6x256xf32> to vector<6x256xf32>
    %21 = vector.shape_cast %18 : vector<6x256xf32> to vector<1x6x256xf32>
    tpu.vector_store %arg4[%c1_13, %c0_14, %c0_15], %21 {strides = array<i32>} : memref<2x6x256xf32, #tpu.memory_space<vmem>>, vector<1x6x256xf32>,
    return
  }
  func.func @transform_0(%arg0: i32) -> (i32, i32, i32) {
    %c0_i32 = arith.constant 0 : i32
    %c0_i32_0 = arith.constant 0 : i32
    %c0_i32_1 = arith.constant 0 : i32
    return %c0_i32, %c0_i32_0, %arg0 : i32, i32, i32
  }
  func.func @transform_1(%arg0: i32) -> (i32, i32, i32) {
    %c0_i32 = arith.constant 0 : i32
    %c0_i32_0 = arith.constant 0 : i32
    %c0_i32_1 = arith.constant 0 : i32
    return %c0_i32, %c0_i32_0, %arg0 : i32, i32, i32
  }
  func.func @transform_2(%arg0: i32) -> (i32, i32) {
    %c0_i32 = arith.constant 0 : i32
    %c0_i32_0 = arith.constant 0 : i32
    return %c0_i32, %arg0 : i32, i32
  }
  func.func @transform_3(%arg0: i32) -> (i32, i32, i32) {
    %c0_i32 = arith.constant 0 : i32
    %c0_i32_0 = arith.constant 0 : i32
    %c0_i32_1 = arith.constant 0 : i32
    return %c0_i32, %c0_i32_0, %arg0 : i32, i32, i32
  }
}

</mosaic_0001>

<bundles_post_ra>
// kernel: pointwise_classifiers.1
= control target key start
LH: loop header
LB: loop body
LE: loop exit
PB: predicated region body
PF: predicated region fallthrough
CT: control target
= control target key end

     0   :  { %vm277_vm0 = vcmask 1041409   ;;  %vm280_vm1 = vcmask 1042434   ;;  %vm283_vm2 = vcmask 1043459   ;;  %vm286_vm3 = vcmask 1044484   ;;  %s1230_s1 = inlined_call_operand.vmem [shape: f32[6,32,256], index: 1, kind: input, shape index: {}]   ;;  %s1231_s0 = inlined_call_operand.vmem [shape: f32[2,32,256], index: 0, kind: input, shape index: {}]   ;;  %s1232_s2 = inlined_call_operand.vmem [shape: f32[6,256], index: 2, kind: input, shape index: {}]   ;;  %s1233_s3 = inlined_call_operand.vmem [shape: f32[2,6,256], index: 3, kind: output, shape index: {}]  }
   0x1   :  { %v556_v0 = vld [vmem:[%s1230_s1] sm:$0xff]  ;;  %v561_v1 = vld [vmem:[%s1230_s1 + $0x8] sm:$0xff]  ;;  %v566_v2 = vld [vmem:[%s1230_s1 + $0x10] sm:$0xff]  ;;  %vm289_vm4 = vcmask 1045509  }
   0x2   :  { %1292 = vst [vmem:[#allocation2_spill] sm:$0xff] %v556_v0  ;;  %1293 = vst [vmem:[#allocation3_spill] sm:$0xff] %v561_v1  ;;  %v571_v3 = vld [vmem:[%s1230_s1 + $0x18] sm:$0xff]  ;;  %v576_v4 = vld [vmem:[%s1230_s1 + $0x40] sm:$0xff] }
   0x3   :  { %1294 = vst [vmem:[#allocation4_spill] sm:$0xff] %v566_v2  ;;  %1295 = vst [vmem:[#allocation5_spill] sm:$0xff] %v571_v3  ;;  %v581_v5 = vld [vmem:[%s1230_s1 + $0x48] sm:$0xff]  ;;  %v586_v6 = vld [vmem:[%s1230_s1 + $0x20] sm:$0xff] }
   0x4   :  { %1296 = vst [vmem:[#allocation6_spill] sm:$0xff] %v576_v4  ;;  %1297 = vst [vmem:[#allocation7_spill] sm:$0xff] %v581_v5  ;;  %v591_v7 = vld [vmem:[%s1230_s1 + $0x28] sm:$0xff]  ;;  %v596_v8 = vld [vmem:[%s1230_s1 + $0x30] sm:$0xff] }
   0x5   :  { %1298 = vst [vmem:[#allocation8_spill] sm:$0xff] %v586_v6  ;;  %1299 = vst [vmem:[#allocation9_spill] sm:$0xff] %v591_v7  ;;  %v601_v9 = vld [vmem:[%s1230_s1 + $0x50] sm:$0xff]  ;;  %v606_v10 = vld [vmem:[%s1230_s1 + $0x80] sm:$0xff] }
   0x6   :  { %1300 = vst [vmem:[#allocation10_spill] sm:$0xff] %v596_v8  ;;  %1301 = vst [vmem:[#allocation11_spill] sm:$0xff] %v601_v9  ;;  %v611_v11 = vld [vmem:[%s1230_s1 + $0xc0] sm:$0xff]  ;;  %v616_v12 = vld [vmem:[%s1230_s1 + $0x38] sm:$0xff] }
   0x7   :  { %1302 = vst [vmem:[#allocation12_spill] sm:$0xff] %v606_v10  ;;  %1303 = vst [vmem:[#allocation13_spill] sm:$0xff] %v611_v11  ;;  %v621_v13 = vld [vmem:[%s1230_s1 + $0x58] sm:$0xff]  ;;  %v626_v14 = vld [vmem:[%s1230_s1 + $0x60] sm:$0xff] }
   0x8   :  { %1304 = vst [vmem:[#allocation14_spill] sm:$0xff] %v616_v12  ;;  %1305 = vst [vmem:[#allocation15_spill] sm:$0xff] %v621_v13  ;;  %v631_v15 = vld [vmem:[%s1230_s1 + $0x68] sm:$0xff]  ;;  %v636_v16 = vld [vmem:[%s1231_s0] sm:$0xff] }
   0x9   :  { %1306 = vst [vmem:[#allocation16_spill] sm:$0xff] %v626_v14  ;;  %1307 = vst [vmem:[#allocation17_spill] sm:$0xff] %v631_v15  ;;  %v641_v17 = vld [vmem:[%s1230_s1 + $0x70] sm:$0xff]  ;;  %v646_v18 = vld [vmem:[%s1230_s1 + $0x78] sm:$0xff]  ;;  %v705_v30 = vmul.f32 %v636_v16, %v556_v0  ;;  %v709_v31 = vmul.f32 %v636_v16, %v576_v4  ;;  %v713_v32 = vmul.f32 %v636_v16, %v606_v10 }
   0xa   :  { %1308 = vst [vmem:[#allocation18_spill] sm:$0xff] %v641_v17  ;;  %1309 = vst [vmem:[#allocation19_spill] sm:$0xff] %v646_v18  ;;  %v651_v19 = vld [vmem:[%s1230_s1 + $0x88] sm:$0xff]  ;;  %v656_v20 = vld [vmem:[%s1230_s1 + $0x90] sm:$0xff]  ;;  %v717_v33 = vmul.f32 %v636_v16, %v611_v11 }
   0xb   :  { %1310 = vst [vmem:[#allocation20_spill] sm:$0xff] %v651_v19  ;;  %1311 = vst [vmem:[#allocation21_spill] sm:$0xff] %v656_v20  ;;  %v661_v21 = vld [vmem:[%s1231_s0 + $0x8] sm:$0xff]  ;;  %v666_v22 = vld [vmem:[%s1231_s0 + $0x10] sm:$0xff] }
   0xc   :  { %v671_v23 = vld [vmem:[%s1230_s1 + $0x98] sm:$0xff]  ;;  %v676_v24 = vld [vmem:[%s1230_s1 + $0xa0] sm:$0xff]  ;;  %v681_v25 = vld [vmem:[%s1230_s1 + $0xa8] sm:$0xff]  ;;  %v73_v38 = vmul.f32 %v661_v21, %v561_v1  ;;  %v74_v39 = vmul.f32 %v666_v22, %v566_v2  ;;  %v81_v41 = vmul.f32 %v661_v21, %v581_v5  ;;  %v82_v48 = vmul.f32 %v666_v22, %v601_v9 }
   0xd   :  { %1312 = vst [vmem:[#allocation22_spill] sm:$0xff] %v671_v23  ;;  %1313 = vst [vmem:[#allocation23_spill] sm:$0xff] %v676_v24  ;;  %v686_v26 = vld [vmem:[%s1230_s1 + $0xb0] sm:$0xff]  ;;  %v691_v27 = vld [vmem:[%s1231_s0 + $0x18] sm:$0xff]  ;;  %v89_v61 = vmul.f32 %v661_v21, %v651_v19  ;;  %v90_v62 = vmul.f32 %v666_v22, %v656_v20 }
   0xe   :  { %1314 = vst [vmem:[#allocation24_spill] sm:$0xff] %v681_v25  ;;  %1315 = vst [vmem:[#allocation25_spill] sm:$0xff] %v686_v26  ;;  %v696_v28 = vld [vmem:[%s1231_s0 + $0x20] sm:$0xff]  ;;  %v701_v29 = vld [vmem:[%s1231_s0 + $0x28] sm:$0xff]  ;;  %v75_v40 = vmul.f32 %v691_v27, %v571_v3  ;;  %v83_v53 = vmul.f32 %v691_v27, %v621_v13  ;;  %v91_v19 = vmul.f32 %v691_v27, %v671_v23 }
   0xf   :  { %v722_v34 = vld [vmem:[%s1230_s1 + $0xb8] sm:$0xff]  ;;  %v727_v35 = vld [vmem:[%s1230_s1 + $0xc8] sm:$0xff]  ;;  %v732_v36 = vld [vmem:[%s1231_s0 + $0x30] sm:$0xff]  ;;  %v76_v45 = vmul.f32 %v696_v28, %v586_v6  ;;  %v77_v46 = vmul.f32 %v701_v29, %v591_v7  ;;  %v84_v54 = vmul.f32 %v696_v28, %v626_v14  ;;  %v85_v55 = vmul.f32 %v701_v29, %v631_v15 }
  0x10   :  { %1316 = vst [vmem:[#allocation26_spill] sm:$0xff] %v722_v34  ;;  %1317 = vst [vmem:[#allocation27_spill] sm:$0xff] %v727_v35  ;;  %v737_v37 = vld [vmem:[%s1231_s0 + $0x38] sm:$0xff]  ;;  %v750_v42 = vld [vmem:[%s1230_s1 + $0xd0] sm:$0xff]  ;;  %v768_v47 = vmul.f32 %v732_v36, %v596_v8  ;;  %v86_v59 = vmul.f32 %v732_v36, %v641_v17  ;;  %v92_v20 = vmul.f32 %v696_v28, %v676_v24 }
  0x11   :  { %1318 = vst [vmem:[#allocation28_spill] sm:$0xff] %v750_v42  ;;  %v755_v43 = vld [vmem:[%s1230_s1 + $0xd8] sm:$0xff]  ;;  %v760_v44 = vld [vmem:[%s1230_s1 + $0xe0] sm:$0xff]  ;;  %v775_v49 = vld [vmem:[%s1230_s1 + $0xe8] sm:$0xff]  ;;  %v79_v52 = vmul.f32 %v737_v37, %v616_v12  ;;  %v87_v60 = vmul.f32 %v737_v37, %v646_v18  ;;  %v93_v18 = vmul.f32 %v701_v29, %v681_v25  ;;  %v94_v17 = vmul.f32 %v732_v36, %v686_v26 }
  0x12   :  { %1319 = vst [vmem:[#allocation29_spill] sm:$0xff] %v755_v43  ;;  %1320 = vst [vmem:[#allocation30_spill] sm:$0xff] %v760_v44  ;;  %v780_v50 = vld [vmem:[%s1230_s1 + $0xf0] sm:$0xff]  ;;  %v785_v51 = vld [vmem:[%s1230_s1 + $0xf8] sm:$0xff]  ;;  %v95_v25 = vmul.f32 %v737_v37, %v722_v34  ;;  %v97_v26 = vmul.f32 %v661_v21, %v727_v35  ;;  %v98_v23 = vmul.f32 %v666_v22, %v750_v42 }
  0x13   :  { %1321 = vst [vmem:[#allocation31_spill] sm:$0xff] %v775_v49  ;;  %1322 = vst [vmem:[#allocation32_spill] sm:$0xff] %v780_v50  ;;  %v798_v56 = vld [vmem:[%s1230_s1 + $0x100] sm:$0xff]  ;;  %v803_v57 = vld [vmem:[%s1230_s1 + $0x108] sm:$0xff]  ;;  %v99_v13 = vmul.f32 %v691_v27, %v755_v43  ;;  %v100_v42 = vmul.f32 %v696_v28, %v760_v44  ;;  %v101_v43 = vmul.f32 %v701_v29, %v775_v49 }
  0x14   :  { %1323 = vst [vmem:[#allocation33_spill] sm:$0xff] %v785_v51  ;;  %1324 = vst [vmem:[#allocation34_spill] sm:$0xff] %v798_v56  ;;  %v808_v58 = vld [vmem:[%s1230_s1 + $0x110] sm:$0xff]  ;;  %v821_v63 = vld [vmem:[%s1230_s1 + $0x118] sm:$0xff]  ;;  %v102_v34 = vmul.f32 %v732_v36, %v780_v50  ;;  %v103_v4 = vmul.f32 %v737_v37, %v785_v51  ;;  %v889_v12 = vmul.f32 %v636_v16, %v798_v56 }
  0x15   :  { %1325 = vst [vmem:[#allocation35_spill] sm:$0xff] %v803_v57  ;;  %1326 = vst [vmem:[#allocation36_spill] sm:$0xff] %v808_v58  ;;  %v826_v11 = vld [vmem:[%s1230_s1 + $0x120] sm:$0xff]  ;;  %v831_v10 = vld [vmem:[%s1230_s1 + $0x128] sm:$0xff]  ;;  %v893_v8 = vmul.f32 %v661_v21, %v803_v57  ;;  %v897_v44 = vmul.f32 %v666_v22, %v808_v58  ;;  %v901_v49 = vmul.f32 %v691_v27, %v821_v63 }
  0x16   :  { %1327 = vst [vmem:[#allocation37_spill] sm:$0xff] %v821_v63  ;;  %1328 = vst [vmem:[#allocation38_spill] sm:$0xff] %v826_v11  ;;  %v844_v15 = vld [vmem:[%s1230_s1 + $0x130] sm:$0xff]  ;;  %v849_v14 = vld [vmem:[%s1230_s1 + $0x138] sm:$0xff]  ;;  %v905_v50 = vmul.f32 %v696_v28, %v826_v11  ;;  %v909_v56 = vmul.f32 %v701_v29, %v831_v10  ;;  %v120_v51 = vadd.f32 %v74_v39, %v705_v30 }
  0x17   :  { %1329 = vst [vmem:[#allocation39_spill] sm:$0xff] %v831_v10  ;;  %1330 = vst [vmem:[#allocation40_spill] sm:$0xff] %v844_v15  ;;  %v854_v24 = vld [vmem:[%s1230_s1 + $0x140] sm:$0xff]  ;;  %v867_v9 = vld [vmem:[%s1230_s1 + $0x148] sm:$0xff]  ;;  %v913_v57 = vmul.f32 %v732_v36, %v844_v15  ;;  %v917_v58 = vmul.f32 %v737_v37, %v849_v14  ;;  %v138_v7 = vadd.f32 %v82_v48, %v709_v31 }
  0x18   :  { %1331 = vst [vmem:[#allocation41_spill] sm:$0xff] %v849_v14  ;;  %1332 = vst [vmem:[#allocation42_spill] sm:$0xff] %v854_v24  ;;  %v872_v5 = vld [vmem:[%s1230_s1 + $0x150] sm:$0xff]  ;;  %v877_v35 = vld [vmem:[%s1230_s1 + $0x158] sm:$0xff]  ;;  %v921_v63 = vmul.f32 %v636_v16, %v854_v24  ;;  %v925_v11 = vmul.f32 %v661_v21, %v867_v9  ;;  %v129_v14 = vadd.f32 %v75_v40, %v73_v38 }
  0x19   :  { %1333 = vst [vmem:[#allocation43_spill] sm:$0xff] %v867_v9  ;;  %1334 = vst [vmem:[#allocation44_spill] sm:$0xff] %v872_v5  ;;  %v929_v10 = vmul.f32 %v666_v22, %v872_v5  ;;  %v933_v15 = vmul.f32 %v691_v27, %v877_v35  ;;  %v147_v6 = vadd.f32 %v83_v53, %v81_v41  ;;  %v948_v53 = vld [vmem:[%s1230_s1 + $0x168] sm:$0xff] }
  0x1a   :  { %1335 = vst [vmem:[#allocation45_spill] sm:$0xff] %v877_v35  ;;  %v156_v16 = vadd.f32 %v90_v62, %v713_v32  ;;  %v165_v24 = vadd.f32 %v91_v19, %v89_v61  ;;  %v174_v21 = vadd.f32 %v98_v23, %v717_v33  ;;  %v183_v9 = vadd.f32 %v99_v13, %v97_v26 }
  0x1b   :  { %v121_v3 = vadd.f32 %v120_v51, %v76_v45  ;;  %v130_v2 = vadd.f32 %v129_v14, %v77_v46  ;;  %v139_v22 = vadd.f32 %v138_v7, %v84_v54  ;;  %v148_v5 = vadd.f32 %v147_v6, %v85_v55  ;;  %v943_v45 = vld [vmem:[%s1230_s1 + $0x160] sm:$0xff]  ;;  %v953_v54 = vld [vmem:[%s1230_s1 + $0x170] sm:$0xff]  ;;  %v958_v55 = vld [vmem:[%s1230_s1 + $0x178] sm:$0xff] }
  0x1c   :  { %v157_v1 = vadd.f32 %v156_v16, %v92_v20  ;;  %v166_v0 = vadd.f32 %v165_v24, %v93_v18  ;;  %v175_v27 = vadd.f32 %v174_v21, %v100_v42  ;;  %v184_v35 = vadd.f32 %v183_v9, %v101_v43 }
  0x1d   :  { %v122_v30 = vadd.f32 %v121_v3, %v768_v47  ;;  %v131_v38 = vadd.f32 %v130_v2, %v79_v52  ;;  %v140_v39 = vadd.f32 %v139_v22, %v86_v59  ;;  %v149_v31 = vadd.f32 %v148_v5, %v87_v60 }
  0x1e   :  { %v158_v40 = vadd.f32 %v157_v1, %v94_v17  ;;  %v167_v41 = vadd.f32 %v166_v0, %v95_v25  ;;  %v176_v32 = vadd.f32 %v175_v27, %v102_v34  ;;  %v185_v19 = vadd.f32 %v184_v35, %v103_v4 }
  0x1f   :  { %v123_v48 = vrot.slane %v122_v30, 4  ;;  %v132_v23 = vrot.slane %v131_v38, 4  ;;  %v141_v13 = vrot.slane %v140_v39, 4  ;;  %v150_v26 = vrot.slane %v149_v31, 4 }
  0x20   :  { %v159_v14 = vrot.slane %v158_v40, 4  ;;  %v168_v7 = vrot.slane %v167_v41, 4  ;;  %v177_v6 = vrot.slane %v176_v32, 4  ;;  %v186_v20 = vrot.slane %v185_v19, 4 }
  0x21   :  { %v124_v18 = vadd.f32 %v123_v48, %v122_v30  ;;  %v133_v24 = vadd.f32 %v132_v23, %v131_v38  ;;  %v142_v9 = vadd.f32 %v141_v13, %v140_v39  ;;  %v151_v33 = vadd.f32 %v150_v26, %v149_v31 }
  0x22   :  { %v160_v3 = vadd.f32 %v159_v14, %v158_v40  ;;  %v169_v2 = vadd.f32 %v168_v7, %v167_v41  ;;  %v178_v42 = vadd.f32 %v177_v6, %v176_v32  ;;  %v187_v5 = vadd.f32 %v186_v20, %v185_v19  ;;  %v971_v14 = vld [vmem:[%s1232_s2] sm:$0x3f] }
  0x23   :  { %v125_v1 = vrot.slane %v124_v18, 2  ;;  %v134_v0 = vrot.slane %v133_v24, 2  ;;  %v143_v17 = vrot.slane %v142_v9, 2  ;;  %v152_v4 = vrot.slane %v151_v33, 2  ;;  %1336 = vst [vmem:[#allocation46_spill] sm:$0xff] %v971_v14 }
  0x24   :  { %v161_v25 = vrot.slane %v160_v3, 2  ;;  %v170_v34 = vrot.slane %v169_v2, 2  ;;  %v179_v35 = vrot.slane %v178_v42, 2  ;;  %v188_v43 = vrot.slane %v187_v5, 2 }
  0x25   :  { %v126_v46 = vadd.f32 %v125_v1, %v124_v18  ;;  %v135_v47 = vadd.f32 %v134_v0, %v133_v24  ;;  %v144_v51 = vadd.f32 %v143_v17, %v142_v9  ;;  %v153_v52 = vadd.f32 %v152_v4, %v151_v33 }
  0x26   :  { %v162_v59 = vadd.f32 %v161_v25, %v160_v3  ;;  %v171_v60 = vadd.f32 %v170_v34, %v169_v2  ;;  %v180_v61 = vadd.f32 %v179_v35, %v178_v42  ;;  %v189_v62 = vadd.f32 %v188_v43, %v187_v5 }
  0x27   :  { %v127_v16 = vrot.slane %v126_v46, 1  ;;  %v136_v21 = vrot.slane %v135_v47, 1  ;;  %v145_v22 = vrot.slane %v144_v51, 1  ;;  %v154_v27 = vrot.slane %v153_v52, 1 }
  0x28   :  { %v163_v30 = vrot.slane %v162_v59, 1  ;;  %v172_v38 = vrot.slane %v171_v60, 1  ;;  %v181_v39 = vrot.slane %v180_v61, 1  ;;  %v190_v31 = vrot.slane %v189_v62, 1 }
  0x29   :  { %v116_v40 = vmul.f32 %v696_v28, %v943_v45  ;;  %v117_v41 = vmul.f32 %v701_v29, %v948_v53  ;;  %v118_v32 = vmul.f32 %v732_v36, %v953_v54  ;;  %v119_v19 = vmul.f32 %v737_v37, %v958_v55  ;;  %v976_v28 = vld [vmem:[%s1232_s2 + $0x8] sm:$0x3f] }
  0x2a   :  { %v128_v48 = vadd.f32 %v127_v16, %v126_v46  ;;  %v137_v23 = vadd.f32 %v136_v21, %v135_v47  ;;  %v146_v13 = vadd.f32 %v145_v22, %v144_v51  ;;  %v155_v26 = vadd.f32 %v154_v27, %v153_v52  ;;  %1337 = vst [vmem:[#allocation47_spill] sm:$0xff] %v976_v28 }
  0x2b   :  { %v192_v29 = vadd.f32 %v897_v44, %v889_v12  ;;  %v201_v36 = vadd.f32 %v901_v49, %v893_v8  ;;  %v210_v37 = vadd.f32 %v929_v10, %v921_v63  ;;  %v219_v7 = vadd.f32 %v933_v15, %v925_v11 }
  0x2c   :  { %v164_v6 = vadd.f32 %v163_v30, %v162_v59  ;;  %v173_v20 = vadd.f32 %v172_v38, %v171_v60  ;;  %v182_v18 = vadd.f32 %v181_v39, %v180_v61  ;;  %v191_v24 = vadd.f32 %v190_v31, %v189_v62 }
  0x2d   :  { %v193_v9 = vadd.f32 %v192_v29, %v905_v50  ;;  %v202_v33 = vadd.f32 %v201_v36, %v909_v56  ;;  %v211_v3 = vadd.f32 %v210_v37, %v116_v40  ;;  %v220_v12 = vadd.f32 %v219_v7, %v117_v41 }
  0x2e   :  { %v1287_v44 = vrot.slane %v971_v14, 1  ;;  %v1286_v8 = vrot.slane %v976_v28, 1  ;;  %v1285_v10 = vrot.slane %v971_v14, 2  ;;  %v1284_v49 = vrot.slane %v976_v28, 2 }
  0x2f   :  { %v194_v11 = vadd.f32 %v193_v9, %v913_v57  ;;  %v203_v15 = vadd.f32 %v202_v33, %v917_v58  ;;  %v212_v63 = vadd.f32 %v211_v3, %v118_v32  ;;  %v221_v2 = vadd.f32 %v220_v12, %v119_v19 }
  0x30   :  { %v1283_v50 = vrot.slane %v971_v14, 3  ;;  %v1282_v56 = vrot.slane %v976_v28, 3  ;;  %v1281_v42 = vrot.slane %v971_v14, 4  ;;  %v252_v5 = vadd.f32 %v128_v48, %v971_v14 }
  0x31   :  { %v195_v1 = vrot.slane %v194_v11, 4  ;;  %v204_v0 = vrot.slane %v203_v15, 4  ;;  %v213_v17 = vrot.slane %v212_v63, 4  ;;  %v222_v4 = vrot.slane %v221_v2, 4 }
  0x32   :  { %v254_v57 = vadd.f32 %v1287_v44, %v146_v13  ;;  %v255_v58 = vadd.f32 %v1286_v8, %v155_v26  ;;  %v256_v25 = vadd.f32 %v1285_v10, %v164_v6  ;;  %v257_v34 = vadd.f32 %v1284_v49, %v173_v20 }
  0x33   :  { %v196_v35 = vadd.f32 %v195_v1, %v194_v11  ;;  %v205_v43 = vadd.f32 %v204_v0, %v203_v15  ;;  %v214_v46 = vadd.f32 %v213_v17, %v212_v63  ;;  %v223_v47 = vadd.f32 %v222_v4, %v221_v2  ;;  %v1036_v1 = vld [vmem:[%s1231_s0 + $0x48] sm:$0xff] }
  0x34   :  { %v253_v51 = vadd.f32 %v137_v23, %v976_v28  ;;  %v258_v52 = vadd.f32 %v1283_v50, %v182_v18  ;;  %v259_v59 = vadd.f32 %v1282_v56, %v191_v24  ;;  %v276_v60 = vrot.slane %v254_v57, 7 }
  0x35   :  { %v197_v61 = vrot.slane %v196_v35, 2  ;;  %v206_v62 = vrot.slane %v205_v43, 2  ;;  %v215_v16 = vrot.slane %v214_v46, 2  ;;  %v224_v21 = vrot.slane %v223_v47, 2 }
  0x36   :  { %v278_v22 = vsel %vm277_vm0, %v276_v60, %v252_v5  ;;  %v279_v27 = vrot.slane %v256_v25, 6  ;;  %v291_v30 = vrot.slane %v255_v58, 7  ;;  %v293_v38 = vrot.slane %v257_v34, 6  ;;  %v1031_v5 = vld [vmem:[%s1231_s0 + $0x40] sm:$0xff]  ;;  %v1041_v58 = vld [vmem:[%s1231_s0 + $0x50] sm:$0xff]  ;;  %v1046_v25 = vld [vmem:[%s1231_s0 + $0x58] sm:$0xff] }
  0x37   :  { %v198_v39 = vadd.f32 %v197_v61, %v196_v35  ;;  %v207_v31 = vadd.f32 %v206_v62, %v205_v43  ;;  %v216_v40 = vadd.f32 %v215_v16, %v214_v46  ;;  %v225_v41 = vadd.f32 %v224_v21, %v223_v47  ;;  %v1051_v34 = vld [vmem:[%s1231_s0 + $0x60] sm:$0xff]  ;;  %v1056_v35 = vld [vmem:[%s1231_s0 + $0x68] sm:$0xff]  ;;  %v1341_v60 = vld [vmem:[#allocation5_spill] sm:$0xff] }
  0x38   :  { %v1280_v32 = vrot.slane %v976_v28, 4  ;;  %v1279_v19 = vrot.slane %v971_v14, 5  ;;  %v1278_v48 = vrot.slane %v976_v28, 5  ;;  %v292_v23 = vsel %vm277_vm0, %v291_v30, %v253_v51  ;;  %v1338_v43 = vld [vmem:[#allocation2_spill] sm:$0xff]  ;;  %v1339_v47 = vld [vmem:[#allocation3_spill] sm:$0xff]  ;;  %v1071_v21 = vld [vmem:[%s1231_s0 + $0x70] sm:$0xff] }
  0x39   :  { %v199_v13 = vrot.slane %v198_v39, 1  ;;  %v208_v26 = vrot.slane %v207_v31, 1  ;;  %v217_v29 = vrot.slane %v216_v40, 1  ;;  %v226_v36 = vrot.slane %v225_v41, 1 }
  0x3a   :  { %v281_v37 = vsel %vm280_vm1, %v279_v27, %v278_v22  ;;  %v282_v7 = vrot.slane %v258_v52, 5  ;;  %v294_v6 = vsel %vm280_vm1, %v293_v38, %v292_v23  ;;  %v295_v20 = vrot.slane %v259_v59, 5  ;;  %v1340_v52 = vld [vmem:[#allocation4_spill] sm:$0xff]  ;;  %v1076_v22 = vld [vmem:[%s1231_s0 + $0x78] sm:$0xff] }
  0x3b   :  { %v200_v18 = vadd.f32 %v199_v13, %v198_v39  ;;  %v209_v24 = vadd.f32 %v208_v26, %v207_v31  ;;  %v218_v9 = vadd.f32 %v217_v29, %v216_v40  ;;  %v227_v33 = vadd.f32 %v226_v36, %v225_v41  ;;  %v1342_v27 = vld [vmem:[#allocation8_spill] sm:$0xff]  ;;  %v1343_v38 = vld [vmem:[#allocation9_spill] sm:$0xff]  ;;  %v1344_v41 = vld [vmem:[#allocation10_spill] sm:$0xff] }
  0x3c   :  { %v284_v63 = vsel %vm283_vm2, %v282_v7, %v281_v37  ;;  %v296_v2 = vsel %vm283_vm2, %v295_v20, %v294_v6  ;;  %v314_v46 = vmul.f32 %v1031_v5, %v1338_v43  ;;  %v315_v51 = vmul.f32 %v1036_v1, %v1339_v47  ;;  %v1345_v13 = vld [vmem:[#allocation14_spill] sm:$0xff]  ;;  %v1347_v37 = vld [vmem:[#allocation7_spill] sm:$0xff]  ;;  %v1356_v43 = vld [vmem:[#allocation21_spill] sm:$0xff] }
  0x3d   :  { %v260_v3 = vadd.f32 %v1281_v42, %v200_v18  ;;  %v261_v12 = vadd.f32 %v1280_v32, %v209_v24  ;;  %v262_v11 = vadd.f32 %v1279_v19, %v218_v9  ;;  %v263_v15 = vadd.f32 %v1278_v48, %v227_v33  ;;  %v1346_v29 = vld [vmem:[#allocation6_spill] sm:$0xff]  ;;  %v1348_v6 = vld [vmem:[#allocation11_spill] sm:$0xff]  ;;  %v1350_v9 = vld [vmem:[#allocation16_spill] sm:$0xff] }
  0x3e   :  { %v316_v59 = vmul.f32 %v1041_v58, %v1340_v52  ;;  %v317_v61 = vmul.f32 %v1046_v25, %v1341_v60  ;;  %v318_v30 = vmul.f32 %v1051_v34, %v1342_v27  ;;  %v319_v39 = vmul.f32 %v1056_v35, %v1343_v38  ;;  %v1349_v18 = vld [vmem:[#allocation15_spill] sm:$0xff]  ;;  %v1357_v52 = vld [vmem:[#allocation22_spill] sm:$0xff]  ;;  %v1359_v27 = vld [vmem:[#allocation24_spill] sm:$0xff] }
  0x3f   :  { %v285_v0 = vrot.slane %v260_v3, 4  ;;  %v288_v17 = vrot.slane %v262_v11, 3  ;;  %v297_v4 = vrot.slane %v261_v12, 4  ;;  %v299_v57 = vrot.slane %v263_v15, 3  ;;  %v1351_v3 = vld [vmem:[#allocation17_spill] sm:$0xff]  ;;  %v1352_v11 = vld [vmem:[#allocation18_spill] sm:$0xff] }
  0x40   :  { %v320_v23 = vmul.f32 %v1071_v21, %v1344_v41  ;;  %v321_v26 = vmul.f32 %v1076_v22, %v1345_v13  ;;  %v322_v36 = vmul.f32 %v1031_v5, %v1346_v29  ;;  %v323_v7 = vmul.f32 %v1036_v1, %v1347_v37  ;;  %v1361_v41 = vld [vmem:[#allocation26_spill] sm:$0xff]  ;;  %v1362_v29 = vld [vmem:[#allocation13_spill] sm:$0xff] }
  0x41   :  { %v287_v62 = vsel %vm286_vm3, %v285_v0, %v284_v63  ;;  %v298_v16 = vsel %vm286_vm3, %v297_v4, %v296_v2  ;;  %v324_v20 = vmul.f32 %v1041_v58, %v1348_v6  ;;  %v325_v24 = vmul.f32 %v1046_v25, %v1349_v18  ;;  %v1353_v63 = vld [vmem:[#allocation19_spill] sm:$0xff]  ;;  %v1354_v0 = vld [vmem:[#allocation12_spill] sm:$0xff]  ;;  %v1376_v19 = vld [vmem:[#allocation37_spill] sm:$0xff] }
  0x42   :  { %v290_v31 = vsel %vm289_vm4, %v288_v17, %v287_v62  ;;  %v300_v40 = vsel %vm289_vm4, %v299_v57, %v298_v16  ;;  %v326_v33 = vmul.f32 %v1051_v34, %v1350_v9  ;;  %v327_v12 = vmul.f32 %v1056_v35, %v1351_v3  ;;  %v1355_v4 = vld [vmem:[#allocation20_spill] sm:$0xff]  ;;  %v1358_v62 = vld [vmem:[#allocation23_spill] sm:$0xff] }
  0x43   :  { %303 = vst [vmem:[%s1233_s3] sm:$0x3f] %v290_v31  ;;  %304 = vst [vmem:[%s1233_s3 + $0x8] sm:$0x3f] %v300_v40  ;;  %v328_v15 = vmul.f32 %v1071_v21, %v1352_v11  ;;  %v329_v2 = vmul.f32 %v1076_v22, %v1353_v63  ;;  %v330_v17 = vmul.f32 %v1031_v5, %v1354_v0  ;;  %v1360_v31 = vld [vmem:[#allocation25_spill] sm:$0xff]  ;;  %v1363_v6 = vld [vmem:[#allocation27_spill] sm:$0xff] }
  0x44   :  { %v331_v57 = vmul.f32 %v1036_v1, %v1355_v4  ;;  %v332_v47 = vmul.f32 %v1041_v58, %v1356_v43  ;;  %v333_v60 = vmul.f32 %v1046_v25, %v1357_v52  ;;  %v334_v16 = vmul.f32 %v1051_v34, %v1358_v62  ;;  %v1364_v9 = vld [vmem:[#allocation28_spill] sm:$0xff]  ;;  %v1365_v11 = vld [vmem:[#allocation29_spill] sm:$0xff]  ;;  %v1366_v0 = vld [vmem:[#allocation30_spill] sm:$0xff] }
  0x45   :  { %v335_v38 = vmul.f32 %v1056_v35, %v1359_v27  ;;  %v336_v40 = vmul.f32 %v1071_v21, %v1360_v31  ;;  %v337_v13 = vmul.f32 %v1076_v22, %v1361_v41  ;;  %v338_v37 = vmul.f32 %v1031_v5, %v1362_v29  ;;  %v1367_v43 = vld [vmem:[#allocation31_spill] sm:$0xff]  ;;  %v1368_v62 = vld [vmem:[#allocation32_spill] sm:$0xff]  ;;  %v1369_v31 = vld [vmem:[#allocation33_spill] sm:$0xff] }
  0x46   :  { %v339_v18 = vmul.f32 %v1036_v1, %v1363_v6  ;;  %v340_v3 = vmul.f32 %v1041_v58, %v1364_v9  ;;  %v341_v63 = vmul.f32 %v1046_v25, %v1365_v11  ;;  %v342_v4 = vmul.f32 %v1051_v34, %v1366_v0  ;;  %v1370_v29 = vld [vmem:[#allocation34_spill] sm:$0xff]  ;;  %v1372_v9 = vld [vmem:[#allocation35_spill] sm:$0xff]  ;;  %v1374_v11 = vld [vmem:[#allocation36_spill] sm:$0xff] }
  0x47   :  { %v343_v52 = vmul.f32 %v1056_v35, %v1367_v43  ;;  %v344_v27 = vmul.f32 %v1071_v21, %v1368_v62  ;;  %v345_v41 = vmul.f32 %v1076_v22, %v1369_v31  ;;  %v1144_v6 = vmul.f32 %v1031_v5, %v1370_v29  ;;  %v1378_v62 = vld [vmem:[#allocation38_spill] sm:$0xff]  ;;  %v1380_v31 = vld [vmem:[#allocation39_spill] sm:$0xff] }
  0x48   :  { %v1148_v48 = vmul.f32 %v1036_v1, %v1372_v9  ;;  %v1152_v0 = vmul.f32 %v1041_v58, %v1374_v11  ;;  %v1156_v43 = vmul.f32 %v1046_v25, %v1376_v19  ;;  %v1160_v32 = vmul.f32 %v1051_v34, %v1378_v62 }
  0x49   :  { %1371 = vst [vmem:[#allocation2_spill] sm:$0xff] %v1144_v6  ;;  %v1164_v29 = vmul.f32 %v1056_v35, %v1380_v31  ;;  %v362_v42 = vadd.f32 %v316_v59, %v314_v46  ;;  %v371_v56 = vadd.f32 %v317_v61, %v315_v51  ;;  %v380_v9 = vadd.f32 %v324_v20, %v322_v36 }
  0x4a   :  { %1373 = vst [vmem:[#allocation3_spill] sm:$0xff] %v1148_v48  ;;  %1375 = vst [vmem:[#allocation4_spill] sm:$0xff] %v1152_v0  ;;  %v389_v50 = vadd.f32 %v325_v24, %v323_v7  ;;  %v398_v49 = vadd.f32 %v332_v47, %v330_v17  ;;  %v407_v10 = vadd.f32 %v333_v60, %v331_v57  ;;  %v1382_v17 = vld [vmem:[#allocation40_spill] sm:$0xff]  ;;  %v1383_v47 = vld [vmem:[#allocation41_spill] sm:$0xff] }
  0x4b   :  { %1377 = vst [vmem:[#allocation5_spill] sm:$0xff] %v1156_v43  ;;  %1379 = vst [vmem:[#allocation8_spill] sm:$0xff] %v1160_v32  ;;  %v363_v11 = vadd.f32 %v362_v42, %v318_v30  ;;  %v372_v8 = vadd.f32 %v371_v56, %v319_v39  ;;  %v416_v44 = vadd.f32 %v340_v3, %v338_v37 }
  0x4c   :  { %1381 = vst [vmem:[#allocation9_spill] sm:$0xff] %v1164_v29  ;;  %v425_v28 = vadd.f32 %v341_v63, %v339_v18  ;;  %v381_v19 = vadd.f32 %v380_v9, %v326_v33  ;;  %v390_v14 = vadd.f32 %v389_v50, %v327_v12  ;;  %v399_v43 = vadd.f32 %v398_v49, %v334_v16  ;;  %v1384_v18 = vld [vmem:[#allocation42_spill] sm:$0xff]  ;;  %v1385_v63 = vld [vmem:[#allocation43_spill] sm:$0xff] }
  0x4d   :  { %v408_v48 = vadd.f32 %v407_v10, %v335_v38  ;;  %v364_v62 = vadd.f32 %v363_v11, %v320_v23  ;;  %v373_v32 = vadd.f32 %v372_v8, %v321_v26  ;;  %v417_v0 = vadd.f32 %v416_v44, %v342_v4 }
  0x4e   :  { %v426_v6 = vadd.f32 %v425_v28, %v343_v52  ;;  %v382_v31 = vadd.f32 %v381_v19, %v328_v15  ;;  %v391_v29 = vadd.f32 %v390_v14, %v329_v2  ;;  %v400_v46 = vadd.f32 %v399_v43, %v336_v40 }
  0x4f   :  { %v409_v51 = vadd.f32 %v408_v48, %v337_v13  ;;  %v365_v59 = vrot.slane %v364_v62, 4  ;;  %v374_v61 = vrot.slane %v373_v32, 4  ;;  %v418_v36 = vadd.f32 %v417_v0, %v344_v27  ;;  %v1387_v0 = vld [vmem:[#allocation45_spill] sm:$0xff] }
  0x50   :  { %v427_v7 = vadd.f32 %v426_v6, %v345_v41  ;;  %v383_v42 = vrot.slane %v382_v31, 4  ;;  %v392_v56 = vrot.slane %v391_v29, 4  ;;  %v401_v30 = vrot.slane %v400_v46, 4  ;;  %v1386_v41 = vld [vmem:[#allocation44_spill] sm:$0xff] }
  0x51   :  { %v410_v39 = vrot.slane %v409_v51, 4  ;;  %v366_v20 = vadd.f32 %v365_v59, %v364_v62  ;;  %v375_v50 = vadd.f32 %v374_v61, %v373_v32  ;;  %v419_v49 = vrot.slane %v418_v36, 4  ;;  %v1388_v59 = vld [vmem:[#allocation2_spill] sm:$0xff]  ;;  %v1389_v61 = vld [vmem:[#allocation4_spill] sm:$0xff] }
  0x52   :  { %v428_v10 = vrot.slane %v427_v7, 4  ;;  %v384_v23 = vadd.f32 %v383_v42, %v382_v31  ;;  %v393_v8 = vadd.f32 %v392_v56, %v391_v29  ;;  %v402_v44 = vadd.f32 %v401_v30, %v400_v46 }
  0x53   :  { %v411_v28 = vadd.f32 %v410_v39, %v409_v51  ;;  %v367_v26 = vrot.slane %v366_v20, 2  ;;  %v376_v14 = vrot.slane %v375_v50, 2  ;;  %v420_v24 = vadd.f32 %v419_v49, %v418_v36 }
  0x54   :  { %v429_v48 = vadd.f32 %v428_v10, %v427_v7  ;;  %v385_v33 = vrot.slane %v384_v23, 2  ;;  %v394_v12 = vrot.slane %v393_v8, 2  ;;  %v403_v15 = vrot.slane %v402_v44, 2  ;;  %v1390_v7 = vld [vmem:[#allocation3_spill] sm:$0xff] }
  0x55   :  { %v412_v2 = vrot.slane %v411_v28, 2  ;;  %v352_v57 = vmul.f32 %v1071_v21, %v1382_v17  ;;  %v353_v32 = vmul.f32 %v1076_v22, %v1383_v47  ;;  %v421_v60 = vrot.slane %v420_v24, 2 }
  0x56   :  { %v430_v16 = vrot.slane %v429_v48, 2  ;;  %v368_v38 = vadd.f32 %v367_v26, %v366_v20  ;;  %v377_v40 = vadd.f32 %v376_v14, %v375_v50  ;;  %v386_v13 = vadd.f32 %v385_v33, %v384_v23  ;;  %v1393_v20 = vld [vmem:[#allocation9_spill] sm:$0xff] }
  0x57   :  { %v395_v37 = vadd.f32 %v394_v12, %v393_v8  ;;  %v354_v3 = vmul.f32 %v1031_v5, %v1384_v18  ;;  %v355_v4 = vmul.f32 %v1036_v1, %v1385_v63  ;;  %v404_v52 = vadd.f32 %v403_v15, %v402_v44  ;;  %v1396_v12 = vld [vmem:[#allocation47_spill] sm:$0xff] }
  0x58   :  { %v413_v27 = vadd.f32 %v412_v2, %v411_v28  ;;  %v356_v6 = vmul.f32 %v1041_v58, %v1386_v41  ;;  %v357_v43 = vmul.f32 %v1046_v25, %v1387_v0  ;;  %v387_v29 = vrot.slane %v386_v13, 1 }
  0x59   :  { %v396_v9 = vrot.slane %v395_v37, 1  ;;  %v358_v11 = vmul.f32 %v1051_v34, %v943_v45  ;;  %v359_v19 = vmul.f32 %v1056_v35, %v948_v53  ;;  %v422_v5 = vadd.f32 %v421_v60, %v420_v24  ;;  %v1391_v45 = vld [vmem:[#allocation5_spill] sm:$0xff]  ;;  %v1394_v24 = vld [vmem:[#allocation46_spill] sm:$0xff] }
  0x5a   :  { %v431_v62 = vadd.f32 %v430_v16, %v429_v48  ;;  %v360_v1 = vmul.f32 %v1071_v21, %v953_v54  ;;  %v361_v31 = vmul.f32 %v1076_v22, %v958_v55  ;;  %v369_v58 = vrot.slane %v368_v38, 1  ;;  %v1392_v54 = vld [vmem:[#allocation8_spill] sm:$0xff] }
  0x5b   :  { %v378_v46 = vrot.slane %v377_v40, 1  ;;  %v405_v51 = vrot.slane %v404_v52, 1  ;;  %v414_v25 = vrot.slane %v413_v27, 1  ;;  %v434_v36 = vadd.f32 %v1389_v61, %v1388_v59 }
  0x5c   :  { %v443_v34 = vadd.f32 %v1391_v45, %v1390_v7  ;;  %v388_v42 = vadd.f32 %v387_v29, %v386_v13  ;;  %v397_v53 = vadd.f32 %v396_v9, %v395_v37  ;;  %v452_v35 = vadd.f32 %v356_v6, %v354_v3 }
  0x5d   :  { %v461_v56 = vadd.f32 %v357_v43, %v355_v4  ;;  %v423_v30 = vrot.slane %v422_v5, 1  ;;  %v432_v39 = vrot.slane %v431_v62, 1  ;;  %v435_v21 = vadd.f32 %v434_v36, %v1392_v54 }
  0x5e   :  { %v444_v55 = vadd.f32 %v443_v34, %v1393_v20  ;;  %v370_v22 = vadd.f32 %v369_v58, %v368_v38  ;;  %v379_v50 = vadd.f32 %v378_v46, %v377_v40  ;;  %v453_v49 = vadd.f32 %v452_v35, %v358_v11 }
  0x5f   :  { %v462_v10 = vadd.f32 %v461_v56, %v359_v19  ;;  %v406_v23 = vadd.f32 %v405_v51, %v404_v52  ;;  %v415_v8 = vadd.f32 %v414_v25, %v413_v27  ;;  %v436_v44 = vadd.f32 %v435_v21, %v352_v57 }
  0x60   :  { %v445_v28 = vadd.f32 %v444_v55, %v353_v32  ;;  %v454_v26 = vadd.f32 %v453_v49, %v360_v1  ;;  %v1395_v48 = vrot.slane %v1394_v24, 1  ;;  %v1397_v15 = vrot.slane %v1396_v12, 1 }
  0x61   :  { %v463_v14 = vadd.f32 %v462_v10, %v361_v31  ;;  %v424_v17 = vadd.f32 %v423_v30, %v422_v5  ;;  %v433_v47 = vadd.f32 %v432_v39, %v431_v62  ;;  %v437_v60 = vrot.slane %v436_v44, 4 }
  0x62   :  { %v472_v33 = vadd.f32 %v388_v42, %v1395_v48  ;;  %v473_v2 = vadd.f32 %v397_v53, %v1397_v15  ;;  %v446_v16 = vrot.slane %v445_v28, 4  ;;  %v455_v38 = vrot.slane %v454_v26, 4 }
  0x63   :  { %v464_v40 = vrot.slane %v463_v14, 4  ;;  %v470_v13 = vadd.f32 %v370_v22, %v1394_v24  ;;  %v471_v37 = vadd.f32 %v379_v50, %v1396_v12  ;;  %v438_v57 = vadd.f32 %v437_v60, %v436_v44 }
  0x64   :  { %v447_v32 = vadd.f32 %v446_v16, %v445_v28  ;;  %v1398_v18 = vrot.slane %v1394_v24, 2  ;;  %v1399_v63 = vrot.slane %v1396_v12, 2  ;;  %v456_v52 = vadd.f32 %v455_v38, %v454_v26 }
  0x65   :  { %v465_v27 = vadd.f32 %v464_v40, %v463_v14  ;;  %v494_v41 = vrot.slane %v472_v33, 7  ;;  %v504_v6 = vrot.slane %v473_v2, 7  ;;  %v439_v0 = vrot.slane %v438_v57, 2 }
  0x66   :  { %v474_v3 = vadd.f32 %v406_v23, %v1398_v18  ;;  %v475_v4 = vadd.f32 %v415_v8, %v1399_v63  ;;  %v448_v43 = vrot.slane %v447_v32, 2  ;;  %v457_v29 = vrot.slane %v456_v52, 2 }
  0x67   :  { %v466_v9 = vrot.slane %v465_v27, 2  ;;  %v1400_v11 = vrot.slane %v1394_v24, 3  ;;  %v1401_v5 = vrot.slane %v1396_v12, 3  ;;  %v440_v1 = vadd.f32 %v439_v0, %v438_v57 }
  0x68   :  { %v449_v31 = vadd.f32 %v448_v43, %v447_v32  ;;  %v496_v58 = vrot.slane %v474_v3, 6  ;;  %v506_v46 = vrot.slane %v475_v4, 6  ;;  %v458_v51 = vadd.f32 %v457_v29, %v456_v52 }
  0x69   :  { %v476_v19 = vadd.f32 %v424_v17, %v1400_v11  ;;  %v477_v62 = vadd.f32 %v433_v47, %v1401_v5  ;;  %v467_v25 = vadd.f32 %v466_v9, %v465_v27  ;;  %v495_v59 = vsel %vm277_vm0, %v494_v41, %v470_v13 }
  0x6a   :  { %v505_v61 = vsel %vm277_vm0, %v504_v6, %v471_v37  ;;  %v441_v36 = vrot.slane %v440_v1, 1  ;;  %v450_v7 = vrot.slane %v449_v31, 1  ;;  %v459_v45 = vrot.slane %v458_v51, 1 }
  0x6b   :  { %v468_v34 = vrot.slane %v467_v25, 1  ;;  %v498_v42 = vrot.slane %v476_v19, 5  ;;  %v508_v53 = vrot.slane %v477_v62, 5  ;;  %v497_v30 = vsel %vm280_vm1, %v496_v58, %v495_v59 }
  0x6c   :  { %v442_v35 = vadd.f32 %v441_v36, %v440_v1  ;;  %v451_v56 = vadd.f32 %v450_v7, %v449_v31  ;;  %v507_v39 = vsel %vm280_vm1, %v506_v46, %v505_v61  ;;  %v460_v54 = vadd.f32 %v459_v45, %v458_v51 }
  0x6d   :  { %v469_v21 = vadd.f32 %v468_v34, %v467_v25  ;;  %v1402_v20 = vrot.slane %v1394_v24, 4  ;;  %v1403_v22 = vrot.slane %v1396_v12, 4  ;;  %v1404_v49 = vrot.slane %v1394_v24, 5 }
  0x6e   :  { %v1405_v23 = vrot.slane %v1396_v12, 5  ;;  %v499_v44 = vsel %vm283_vm2, %v498_v42, %v497_v30  ;;  %v509_v28 = vsel %vm283_vm2, %v508_v53, %v507_v39 }
  0x6f   :  { %v478_v55 = vadd.f32 %v442_v35, %v1402_v20  ;;  %v479_v50 = vadd.f32 %v451_v56, %v1403_v22  ;;  %v480_v10 = vadd.f32 %v460_v54, %v1404_v49 }
  0x70   :  { %v481_v8 = vadd.f32 %v469_v21, %v1405_v23 }
  0x71   :  { %v500_v26 = vrot.slane %v478_v55, 4  ;;  %v510_v14 = vrot.slane %v479_v50, 4  ;;  %v502_v48 = vrot.slane %v480_v10, 3 }
  0x72   :  { %v512_v33 = vrot.slane %v481_v8, 3 }
  0x73   :  { %v501_v15 = vsel %vm286_vm3, %v500_v26, %v499_v44  ;;  %v511_v2 = vsel %vm286_vm3, %v510_v14, %v509_v28 }
  0x74   :  { %v503_v17 = vsel %vm289_vm4, %v502_v48, %v501_v15  ;;  %v513_v24 = vsel %vm289_vm4, %v512_v33, %v511_v2 }
  0x75   :  { %531 = vst [vmem:[%s1233_s3 + $0x10] sm:$0x3f] %v503_v17  ;;  %532 = vst [vmem:[%s1233_s3 + $0x18] sm:$0x3f] %v513_v24 }

</bundles_post_ra>
